<compile_context>
chip_gen: v7x
topology: tpu7x:2x2x1
jax: 0.10.0
libtpu: 0.0.40
codegen_flags: <defaults>
</compile_context>

<pallas_src>
import functools

import jax
import jax.numpy as jnp
from jax.experimental import pallas as pl
from jax.experimental.pallas import tpu as pltpu


def _masked_dilated_conv_kernel(H, W, d, taps, x_ref, w_ref, b_ref, o_ref):
    # Per grid step (one batch element):
    #   x_ref : (1, Cin, P)    P = H*W + 2*pad, pad = d*W + d  (zero-padded flat HW)
    #   w_ref : (K, Cout, Cin) only the K active taps (5 when blind, 9 otherwise)
    #   b_ref : (Cout, 1)
    #   o_ref : (1, Cout, H*W)
    HW = H * W
    pad = d * W + d
    cout = o_ref.shape[1]

    x = x_ref[0]                                            # (Cin, P), load once

    # Original-image column of every padded flat position: pad = d*W + d, so the
    # original column is (p - d) mod W.  Padding positions get arbitrary column
    # values, but the padding is already zero, so over-masking there is harmless.
    ocol = (jax.lax.broadcasted_iota(jnp.int32, x.shape, 1) + (W - d)) % W
    # A left-shifted tap (dx=-d) only ever legitimately reads columns [0, W-d);
    # reads of the rightmost d columns are row-wraps and must contribute zero.
    # Symmetrically for right-shifted taps and the leftmost d columns.  Masking
    # the input once per direction replaces per-tap (Cout,HW) output selects.
    x_left = jnp.where(ocol < (W - d), x, 0.0)              # taps with dx = -d
    x_right = jnp.where(ocol >= d, x, 0.0)                  # taps with dx = +d

    # Start the accumulator from the broadcast bias (saves the final add).
    acc = jnp.broadcast_to(b_ref[...], (cout, HW)).astype(jnp.float32)
    for t, (dy, dx) in enumerate(taps):                     # unrolled static loop
        src = x_left if dx < 0 else (x_right if dx > 0 else x)
        start = pad + dy * W + dx                           # static, in [0, 2*pad]
        xs = src[:, start:start + HW]                       # (Cin, HW) static slice
        acc = acc + jnp.dot(w_ref[t], xs, preferred_element_type=jnp.float32)

    o_ref[0] = acc.astype(o_ref.dtype)


def new3_forward(x_nchw, weight, bias, dilated_value, blind=True):
    """x_nchw: (N, Cin, H, W); weight: (Cout, Cin, 3, 3); bias: (Cout,)."""
    N, Cin, H, W = x_nchw.shape
    Cout = weight.shape[0]
    d = int(dilated_value)
    assert 0 < d < W and 2 * d <= W, "flat-pad formulation assumes small dilation"
    HW = H * W
    pad = d * W + d
    P = HW + 2 * pad

    # mask = [[1,0,1],[0,1,0],[1,0,1]]: when blind, only 5 taps survive masking,
    # so only those are materialized (skipping the 4 exactly-zero matmuls).
    if blind:
        active = ((0, 0), (0, 2), (1, 1), (2, 0), (2, 2))
    else:
        active = tuple((ky, kx) for ky in range(3) for kx in range(3))
    taps = tuple(((ky - 1) * d, (kx - 1) * d) for ky, kx in active)
    K = len(active)

    w = weight.astype(jnp.float32)
    w_k = jnp.stack([w[:, :, ky, kx] for ky, kx in active], axis=0)   # (K,Cout,Cin)

    # NCHW -> (N, Cin, H*W) is a pure reshape (no HBM transpose); zero-pad the
    # flat spatial axis so every tap shift is an in-bounds static slice.
    x_flat = x_nchw.reshape(N, Cin, HW).astype(jnp.float32)
    x_pad = jnp.pad(x_flat, ((0, 0), (0, 0), (pad, pad)))
    b2 = bias.reshape(Cout, 1).astype(jnp.float32)

    kernel = functools.partial(_masked_dilated_conv_kernel, H, W, d, taps)

    out = pl.pallas_call(
        kernel,
        out_shape=jax.ShapeDtypeStruct((N, Cout, HW), jnp.float32),
        grid_spec=pltpu.PrefetchScalarGridSpec(
            num_scalar_prefetch=0,
            grid=(N,),
            in_specs=[
                pl.BlockSpec((1, Cin, P), lambda n: (n, 0, 0)),       # padded flat x
                pl.BlockSpec((K, Cout, Cin), lambda n: (0, 0, 0)),    # active-tap weights
                pl.BlockSpec((Cout, 1), lambda n: (0, 0)),            # bias
            ],
            out_specs=pl.BlockSpec((1, Cout, HW), lambda n: (n, 0, 0)),
        ),
        compiler_params=pltpu.CompilerParams(
            dimension_semantics=("parallel",)),    # batch axis feeds both TCs
    )(x_pad, w_k, b2)

    # (N, Cout, H*W) -> NCHW is again a pure reshape (no transpose).
    return out.reshape(N, Cout, H, W)


def ref_forward(x, weight, bias, dilated_value, blind=True):
    """Pure-JAX reference mirroring the PyTorch New3.forward."""
    mask = jnp.array([[1, 0, 1], [0, 1, 0], [1, 0, 1]], jnp.float32)
    w = weight * mask[None, None, :, :] if blind else weight
    d = int(dilated_value)
    out = jax.lax.conv_general_dilated(
        x, w, window_strides=(1, 1), padding=((d, d), (d, d)),
        rhs_dilation=(d, d),
        dimension_numbers=("NCHW", "OIHW", "NCHW"))
    return out + bias[None, :, None, None]


if __name__ == "__main__":
    N, in_ch, out_ch, H, W = 2, 4, 4, 16, 16
    dilated_value = 2

    key = jax.random.PRNGKey(0)
    k_x, k_w, k_b = jax.random.split(key, 3)
    x = jax.random.normal(k_x, (N, in_ch, H, W), jnp.float32)
    weight = 0.1 * jax.random.normal(k_w, (out_ch, in_ch, 3, 3), jnp.float32)
    bias = 0.1 * jax.random.normal(k_b, (out_ch,), jnp.float32)

    out = jax.block_until_ready(
        new3_forward(x, weight, bias, dilated_value, blind=True))

    ref = jax.block_until_ready(
        ref_forward(x, weight, bias, dilated_value, blind=True))
    assert out.shape == (N, out_ch, H, W)
    assert jnp.allclose(out, ref, rtol=1e-3, atol=1e-3), \
        f"max abs diff {jnp.max(jnp.abs(out - ref))}"

    print("KERNEL_OK")
</pallas_src>

<mosaic_0001>
module attributes {stable_mosaic.version = 11 : i64} {
  func.func @_masked_dilated_conv_kernel(%arg0: i32, %arg1: memref<1x4x324xf32, #tpu.memory_space<vmem>>, %arg2: memref<5x4x4xf32, #tpu.memory_space<vmem>>, %arg3: memref<4x1xf32, #tpu.memory_space<vmem>>, %arg4: memref<1x4x256xf32, #tpu.memory_space<vmem>>) attributes {dimension_semantics = [#tpu.dimension_semantics<parallel>], iteration_bounds = array<i64: 2>, scalar_prefetch = 0 : i64, scratch_operands = 0 : i64, tpu.core_type = #tpu.core_type<tc>, window_params = [{transform_indices = @transform_0, window_bounds = array<i64: 1, 4, 324>}, {pipeline_mode = #tpu.pipeline_mode<synchronous>, transform_indices = @transform_1, window_bounds = array<i64: 5, 4, 4>}, {pipeline_mode = #tpu.pipeline_mode<synchronous>, transform_indices = @transform_2, window_bounds = array<i64: 4, 1>}, {transform_indices = @transform_3, window_bounds = array<i64: 1, 4, 256>}]} {
    %c0 = arith.constant 0 : index
    %c0_0 = arith.constant 0 : index
    %c0_1 = arith.constant 0 : index
    %0 = vector.load %arg1[%c0, %c0_0, %c0_1] : memref<1x4x324xf32, #tpu.memory_space<vmem>>, vector<1x4x324xf32>
    %1 = vector.shape_cast %0 : vector<1x4x324xf32> to vector<4x324xf32>
    %2 = tpu.iota {dimensions = array<i32: 1>} : vector<4x324xi32>
    %c14_i32 = arith.constant 14 : i32
    %3 = vector.broadcast %c14_i32 : i32 to vector<4x324xi32>
    %4 = arith.addi %2, %3 : vector<4x324xi32>
    %c16_i32 = arith.constant 16 : i32
    %c0_i32 = arith.constant 0 : i32
    %5 = arith.cmpi eq, %c16_i32, %c0_i32 : i32
    %c1_i32 = arith.constant 1 : i32
    %6 = arith.select %5, %c1_i32, %c16_i32 : i32
    %7 = vector.broadcast %6 : i32 to vector<4x324xi32>
    %8 = arith.remsi %4, %7 : vector<4x324xi32>
    %c0_i32_2 = arith.constant 0 : i32
    %9 = vector.broadcast %c0_i32_2 : i32 to vector<4x324xi32>
    %10 = arith.cmpi ne, %8, %9 : vector<4x324xi32>
    %c0_i32_3 = arith.constant 0 : i32
    %11 = vector.broadcast %c0_i32_3 : i32 to vector<4x324xi32>
    %12 = arith.cmpi slt, %8, %11 : vector<4x324xi32>
    %c0_i32_4 = arith.constant 0 : i32
    %13 = arith.cmpi slt, %6, %c0_i32_4 : i32
    %14 = vector.broadcast %13 : i1 to vector<4x324xi1>
    %15 = vector.broadcast %14 : vector<4x324xi1> to vector<4x324xi1>
    %16 = arith.xori %12, %15 : vector<4x324xi1>
    %17 = arith.andi %16, %10 : vector<4x324xi1>
    %18 = vector.broadcast %6 : i32 to vector<4x324xi32>
    %19 = arith.addi %8, %18 : vector<4x324xi32>
    %20 = arith.select %17, %19, %8 : vector<4x324xi1>, vector<4x324xi32>
    %c14_i32_5 = arith.constant 14 : i32
    %21 = vector.broadcast %c14_i32_5 : i32 to vector<4x324xi32>
    %22 = arith.cmpi slt, %20, %21 : vector<4x324xi32>
    %cst = arith.constant 0.000000e+00 : f32
    %23 = vector.broadcast %cst : f32 to vector<4x324xf32>
    %24 = arith.select %22, %1, %23 : vector<4x324xi1>, vector<4x324xf32>
    %c2_i32 = arith.constant 2 : i32
    %25 = vector.broadcast %c2_i32 : i32 to vector<4x324xi32>
    %26 = arith.cmpi sge, %20, %25 : vector<4x324xi32>
    %cst_6 = arith.constant 0.000000e+00 : f32
    %27 = vector.broadcast %cst_6 : f32 to vector<4x324xf32>
    %28 = arith.select %26, %1, %27 : vector<4x324xi1>, vector<4x324xf32>
    %c0_7 = arith.constant 0 : index
    %c0_8 = arith.constant 0 : index
    %29 = vector.load %arg3[%c0_7, %c0_8] : memref<4x1xf32, #tpu.memory_space<vmem>>, vector<4x1xf32>
    %30 = vector.shape_cast %29 : vector<4x1xf32> to vector<4x1xf32>
    %31 = vector.broadcast %30 : vector<4x1xf32> to vector<4x256xf32>
    %32 = vector.extract_strided_slice %24 {offsets = [0, 0], sizes = [4, 256], strides = [1, 1]} : vector<4x324xf32> to vector<4x256xf32>
    %c0_9 = arith.constant 0 : index
    %c0_10 = arith.constant 0 : index
    %c0_11 = arith.constant 0 : index
    %33 = vector.load %arg2[%c0_9, %c0_10, %c0_11] : memref<5x4x4xf32, #tpu.memory_space<vmem>>, vector<1x4x4xf32>
    %34 = vector.shape_cast %33 : vector<1x4x4xf32> to vector<4x4xf32>
    %cst_12 = arith.constant dense<0.000000e+00> : vector<4x256xf32>
    %35 = tpu.matmul %34, %32, %cst_12 {dimension_numbers = #tpu.dot_dimension_numbers<[1], [0], [0], [1], [0, 0, 1, 1], [], []>} : vector<4x4xf32>, vector<4x256xf32>, vector<4x256xf32> -> vector<4x256xf32>
    %36 = arith.addf %31, %35 : vector<4x256xf32>
    %37 = vector.extract_strided_slice %28 {offsets = [0, 4], sizes = [4, 256], strides = [1, 1]} : vector<4x324xf32> to vector<4x256xf32>
    %c1 = arith.constant 1 : index
    %c0_13 = arith.constant 0 : index
    %c0_14 = arith.constant 0 : index
    %38 = vector.load %arg2[%c1, %c0_13, %c0_14] : memref<5x4x4xf32, #tpu.memory_space<vmem>>, vector<1x4x4xf32>
    %39 = vector.shape_cast %38 : vector<1x4x4xf32> to vector<4x4xf32>
    %cst_15 = arith.constant dense<0.000000e+00> : vector<4x256xf32>
    %40 = tpu.matmul %39, %37, %cst_15 {dimension_numbers = #tpu.dot_dimension_numbers<[1], [0], [0], [1], [0, 0, 1, 1], [], []>} : vector<4x4xf32>, vector<4x256xf32>, vector<4x256xf32> -> vector<4x256xf32>
    %41 = arith.addf %36, %40 : vector<4x256xf32>
    %42 = vector.extract_strided_slice %1 {offsets = [0, 34], sizes = [4, 256], strides = [1, 1]} : vector<4x324xf32> to vector<4x256xf32>
    %c2 = arith.constant 2 : index
    %c0_16 = arith.constant 0 : index
    %c0_17 = arith.constant 0 : index
    %43 = vector.load %arg2[%c2, %c0_16, %c0_17] : memref<5x4x4xf32, #tpu.memory_space<vmem>>, vector<1x4x4xf32>
    %44 = vector.shape_cast %43 : vector<1x4x4xf32> to vector<4x4xf32>
    %cst_18 = arith.constant dense<0.000000e+00> : vector<4x256xf32>
    %45 = tpu.matmul %44, %42, %cst_18 {dimension_numbers = #tpu.dot_dimension_numbers<[1], [0], [0], [1], [0, 0, 1, 1], [], []>} : vector<4x4xf32>, vector<4x256xf32>, vector<4x256xf32> -> vector<4x256xf32>
    %46 = arith.addf %41, %45 : vector<4x256xf32>
    %47 = vector.extract_strided_slice %24 {offsets = [0, 64], sizes = [4, 256], strides = [1, 1]} : vector<4x324xf32> to vector<4x256xf32>
    %c3 = arith.constant 3 : index
    %c0_19 = arith.constant 0 : index
    %c0_20 = arith.constant 0 : index
    %48 = vector.load %arg2[%c3, %c0_19, %c0_20] : memref<5x4x4xf32, #tpu.memory_space<vmem>>, vector<1x4x4xf32>
    %49 = vector.shape_cast %48 : vector<1x4x4xf32> to vector<4x4xf32>
    %cst_21 = arith.constant dense<0.000000e+00> : vector<4x256xf32>
    %50 = tpu.matmul %49, %47, %cst_21 {dimension_numbers = #tpu.dot_dimension_numbers<[1], [0], [0], [1], [0, 0, 1, 1], [], []>} : vector<4x4xf32>, vector<4x256xf32>, vector<4x256xf32> -> vector<4x256xf32>
    %51 = arith.addf %46, %50 : vector<4x256xf32>
    %52 = vector.extract_strided_slice %28 {offsets = [0, 68], sizes = [4, 256], strides = [1, 1]} : vector<4x324xf32> to vector<4x256xf32>
    %c4 = arith.constant 4 : index
    %c0_22 = arith.constant 0 : index
    %c0_23 = arith.constant 0 : index
    %53 = vector.load %arg2[%c4, %c0_22, %c0_23] : memref<5x4x4xf32, #tpu.memory_space<vmem>>, vector<1x4x4xf32>
    %54 = vector.shape_cast %53 : vector<1x4x4xf32> to vector<4x4xf32>
    %cst_24 = arith.constant dense<0.000000e+00> : vector<4x256xf32>
    %55 = tpu.matmul %54, %52, %cst_24 {dimension_numbers = #tpu.dot_dimension_numbers<[1], [0], [0], [1], [0, 0, 1, 1], [], []>} : vector<4x4xf32>, vector<4x256xf32>, vector<4x256xf32> -> vector<4x256xf32>
    %56 = arith.addf %51, %55 : vector<4x256xf32>
    %c0_25 = arith.constant 0 : index
    %c0_26 = arith.constant 0 : index
    %c0_27 = arith.constant 0 : index
    %57 = vector.load %arg4[%c0_25, %c0_26, %c0_27] : memref<1x4x256xf32, #tpu.memory_space<vmem>>, vector<1x4x256xf32>
    %58 = vector.shape_cast %57 : vector<1x4x256xf32> to vector<4x256xf32>
    %59 = vector.shape_cast %56 : vector<4x256xf32> to vector<1x4x256xf32>
    tpu.vector_store %arg4[%c0_25, %c0_26, %c0_27], %59 {strides = array<i32>} : memref<1x4x256xf32, #tpu.memory_space<vmem>>, vector<1x4x256xf32>,
    return
  }
  func.func @transform_0(%arg0: i32) -> (i32, i32, i32) {
    %c0_i32 = arith.constant 0 : i32
    %c0_i32_0 = arith.constant 0 : i32
    %c0_i32_1 = arith.constant 0 : i32
    return %arg0, %c0_i32, %c0_i32_0 : i32, i32, i32
  }
  func.func @transform_1(%arg0: i32) -> (i32, i32, i32) {
    %c0_i32 = arith.constant 0 : i32
    %c0_i32_0 = arith.constant 0 : i32
    %c0_i32_1 = arith.constant 0 : i32
    %c0_i32_2 = arith.constant 0 : i32
    return %c0_i32, %c0_i32_0, %c0_i32_1 : i32, i32, i32
  }
  func.func @transform_2(%arg0: i32) -> (i32, i32) {
    %c0_i32 = arith.constant 0 : i32
    %c0_i32_0 = arith.constant 0 : i32
    %c0_i32_1 = arith.constant 0 : i32
    return %c0_i32, %c0_i32_0 : i32, i32
  }
  func.func @transform_3(%arg0: i32) -> (i32, i32, i32) {
    %c0_i32 = arith.constant 0 : i32
    %c0_i32_0 = arith.constant 0 : i32
    %c0_i32_1 = arith.constant 0 : i32
    return %arg0, %c0_i32, %c0_i32_0 : i32, i32, i32
  }
}

</mosaic_0001>

<bundles_post_ra>
// kernel: tpu_custom_call.1
= control target key start
LH: loop header
LB: loop body
LE: loop exit
PB: predicated region body
PF: predicated region fallthrough
CT: control target
= control target key end

     0   :  { %8 = vsyncpa [#allocation3], 0  ;;  %s1086_s0 = inlined_call_operand.vmem [shape: f32[2,4,324], index: 0, kind: input, shape index: {}]   ;;  %s1087_s1 = inlined_call_operand.vmem [shape: f32[5,4,4], index: 1, kind: input, shape index: {}]   ;;  %s1088_s2 = inlined_call_operand.vmem [shape: f32[4,1], index: 2, kind: input, shape index: {}]   ;;  %s1089_s3 = inlined_call_operand.hbm [shape: f32[2,4,256], index: 3, kind: output, shape index: {}]  }
   0x1   :  { %10 = vsyncpa [#allocation3 + $0x1], 0  ;;  %s948_s12 = smov 0   ;;  %s950_s13 = smov 0  }
   0x2   :  { %s952_s14 = smov 0   ;;  %s954_s15 = smov 0  }
   0x3 LB: > { %s969_s16 = sadd.s32 4294967295, %s919_s15   ;;  %s768_s17 = sadd.s32 4294967294, %s919_s15   ;;  %s919_s15 = sphi %s954_s15, %s1095_s15   ;;  %s915_s14 = sphi %s952_s14, %s1094_s14   ;;  %s911_s13 = sphi %s950_s13, %s1093_s13   ;;  %s907_s12 = sphi %s948_s12, %s1092_s12  }
   0x4   : > { %s973_s18 = sadd.s32 1, %s919_s15   ;;  %s91_s19 = sadd.s32 1, %s915_s14 }
   0x5   : > { %s88_s20 = ssub.s32 %s919_s15, %s973_s18  ;;  %p101_p0 = scmp.ne.s32.totalorder %s915_s14, %s911_s13 }
   0x6   : > { %p89_p1 = scmp.eq.s32.totalorder %s88_s20, 0  ;;  %p102_p2 = scmp.eq.s32.totalorder %s969_s16, 1 }
   0x7   : > { %p107_p3 = scmp.ne.s32.totalorder %s911_s13, %s907_s12  ;;  %p108_p4 = scmp.eq.s32.totalorder %s768_s17, 1 }
   0x8   : > { %s984_s21 = scalar_select %p89_p1, %s915_s14, %s91_s19  }
   0x9   : > { %p986_p5 = por %p102_p2, %p101_p0  ;;  %p990_p6 = por %p108_p4, %p107_p3 }
   0xa   : > { %p771_p7 = scmp.ge.s32.totalorder %s919_s15, 1  ;;  %p140_p8 = scmp.lt.s32.totalorder %s919_s15, 3 }
   0xc   : > { %p141_p9 = pnand %p771_p7, %p140_p8 }
   0xd   : > { %p164_p10 = scmp.lt.s32.totalorder (!%p141_p9), %s969_s16, 1  ;;  %v171_v0 = vlaneseq (!%p141_p9)  ;;  %v921_v1 = vmov (!%p141_p9), 0.0   ;;  %s922_s29 = smov (!%p141_p9), 94   ;;  %vm241_vm3 = vcmask (!%p141_p9), 1043456   ;;  %v236_v16 = vld [vmem:[%s1087_s1] sm:$0xf] (!%p141_p9) }
   0xe   : > { %144 = sbr.rel (%p141_p9) target bundleno = 396 (0x18c), region = 32  ;;  %497 = vmatprep.mubr.f32.mxu0 (!%p141_p9), %v921_v1  ;;  %312 = vmatprep.mubr.f32.mxu1 (!%p141_p9), %v921_v1  ;;  %s923_s30 = smov (!%p141_p9), 64   ;;  %vm237_vm6 = vcmask (!%p141_p9), 31744   ;;  %v924_v20 = vmov (!%p141_p9), 0   ;;  %v230_v22 = vld [vmem:[%s1088_s2] sm:$0xf] (!%p141_p9) }
   0xf   : > { %v172_v2 = vand.u32 (!%p141_p9), 127, %v171_v0  ;;  %855 = vset.pattern.permute.xlu0 (!%p141_p9), %v924_v20  ;;  %s925_s6 = smov (!%p141_p9), 124   ;;  %s926_s7 = smov (!%p141_p9), 60   ;;  %vm423_vm8 = vcmask (!%p141_p9), 769024   ;;  %v781_v29 = vld [vmem:[%s1087_s1 + $0x8] sm:$0xf] (!%p141_p9) }
  0x10   : > { %vm515_vm9 = vcmask (!%p141_p9), 523264   ;;  %vm332_vm10 = vcmask (!%p141_p9), 1014784   ;;  %v785_v37 = vld [vmem:[%s1087_s1 + $0xc] sm:$0xf] (!%p141_p9)  ;;  %v777_v40 = vld [vmem:[%s1087_s1 + $0x4] sm:$0xf] (!%p141_p9) }
  0x11   : > { %v175_v3 = vadd.s32 (!%p141_p9), 14, %v172_v2  ;;  %v174_v4 = vadd.s32 (!%p141_p9), 256, %v172_v2  ;;  %v173_v5 = vadd.s32 (!%p141_p9), 128, %v172_v2  ;;  %vm606_vm11 = vcmask (!%p141_p9), 490496   ;;  %v789_v46 = vld [vmem:[%s1087_s1 + $0x10] sm:$0xf] (!%p141_p9) }
  0x12   : > { %s161_s27 = sand.u32 (!%p141_p9), 1, %s911_s13  }
  0x13   : > { %v182_v6 = vand.u32 (!%p141_p9), 15, %v175_v3  ;;  %v177_v7 = vadd.s32 (!%p141_p9), 14, %v174_v4  ;;  %v176_v8 = vadd.s32 (!%p141_p9), 14, %v173_v5  ;;  %s695_s8 = scalar_lea.sflag (!%p141_p9), [#allocation3], %s161_s27 }
  0x15   : > { %s165_s24 = scalar_select %p164_p10, %s969_s16, 1  ;;  %vm214_vm0 = vcmp.lt.s32.totalorder %v182_v6, 14  ;;  %v196_v12 = vand.u32 15, %v177_v7  ;;  %v189_v13 = vand.u32 15, %v176_v8  ;;  %vm224_vm7 = vcmp.ge.s32.totalorder %v182_v6, 2 }
  0x17   : > { %s809_s25 = smul.u32 12, %s165_s24  ;;  %vm216_vm1 = vcmp.lt.s32.totalorder %v196_v12, 14  ;;  %vm215_vm2 = vcmp.lt.s32.totalorder %v189_v13, 14  ;;  %vm225_vm4 = vcmp.ge.s32.totalorder %v189_v13, 2  ;;  %vm226_vm5 = vcmp.ge.s32.totalorder %v196_v12, 2 }
  0x19   : > { %s168_s28 = scalar_lea.vmem %s1086_s0, %s809_s25 }
  0x1a   : > { %v170_v9 = vld [vmem:[%s168_s28 + $0x8] sm:$0xf]  ;;  %v169_v10 = vld [vmem:[%s168_s28] sm:$0xff]  ;;  %s772_s28 = sshll.u32 %s161_s27, 3 }
  0x1b   : > { %421 = vrot.lane.b32.xlu0 %v170_v9, %s922_s29  ;;  %417 = vrot.lane.b32.xlu1 %v169_v10, %s922_s29  ;;  %v219_v11 = vcombine.high %v169_v10, %v169_v10  ;;  %v221_v14 = vsel %vm214_vm0, %v169_v10, 0.0  ;;  %v223_v17 = vsel %vm216_vm1, %v170_v9, 0.0  ;;  %v229_v19 = vsel %vm226_vm5, %v170_v9, 0.0 }
  0x1c   : > { %v227_v21 = vsel %vm224_vm7, %v169_v10, 0.0 }
  0x1d   : > { %v222_v15 = vsel %vm215_vm2, %v219_v11, 0.0  ;;  %v228_v18 = vsel %vm225_vm4, %v219_v11, 0.0 }
  0x1e   : > { %774 = vmatprep.subr.msk.mxu1 %vm241_vm3, %v222_v15 }
  0x1f   : > { %509 = vrot.lane.b32.xlu1 %v221_v14, %s923_s30  ;;  %419 = vrot.lane.b32.xlu0 %v219_v11, %s922_s29  ;;  %s798_s29 = sshll.u32 %s969_s16, 7  ;;  %s927_s16 = smov [#allocation2]  }
  0x20   : > { %775 = vmatpush1.msk.msra.mxu1 %vm241_vm3, %v221_v14  ;;  %s861_s10 = sshll.u32 %s927_s16, 4  ;;  %s862_s10 = int_to_ptr.vmem [resolvable:$false] %s861_s10 }
  0x21   : > { %776 = vmatmul.mubr.msk.f32.vlgmr.msra.gmra.mrb[0].mxu1 %vm237_vm6, %v236_v16  ;;  %s863_s11 = scalar_lea.vmem %s862_s10, 256 }
  0x22   : > { %406 = vmatprep.mubr.f32.mxu1 %v921_v1 }
  0x23   : > { %513 = vrot.lane.b32.xlu0 %v223_v17, %s923_s30  ;;  %511 = vrot.lane.b32.xlu1 %v222_v15, %s923_s30  ;;  %s163_s30 = scalar_lea.vmem [#allocation2], %s772_s28 }
  0x24   : > { %s709_s4 = sshll.u32 %s163_s30, 4  ;;  %s1046_s4 = int_to_ptr.vmem [resolvable:$true] %s709_s4 }
  0x25   : > { %s857_s9 = scalar_lea.vmem %s1046_s4, 128  ;;  %p864_p0 = scmp.lt.s32.totalorder %s1046_s4, %s862_s10 }
  0x26   : > { %p858_p11 = scmp.ne.s32.totalorder %s1046_s4, %s857_s9  ;;  %p865_p1 = scmp.lt.s32.totalorder %s863_s11, %s857_s9 }
  0x27   : > { %328 = vrot.lane.b32.xlu0 %v228_v18, %s925_s6  ;;  %330 = vrot.lane.b32.xlu1 %v229_v19, %s925_s6 }
  0x28   : > { %p859_p12 = pnand %p858_p11, %p986_p5  ;;  %p866_p2 = por %p865_p1, %p864_p0 }
  0x2a   : > { %p860_p13 = pneg %p859_p12 }
  0x2b   : > { %326 = vrot.lane.b32.xlu0 %v227_v21, %s925_s6  ;;  %602 = vrot.lane.b32.xlu1 %v228_v18, %s926_s7 }
  0x2c   : > { %p867_p3 = pnand %p866_p2, %p860_p13 }
  0x2f   : > { %604 = vrot.lane.b32.xlu0 %v229_v19, %s926_s7  ;;  %600 = vrot.lane.b32.xlu1 %v227_v21, %s926_s7  ;;  %s1044_s7 = scalar_lea.hbm %s1089_s3, %s798_s29 }
  0x33   : > { %233 = vperm.xlu0 %855, %v230_v22  }
  0x8d   : > { %v422_v23 = vpop.permute.xlu0 %421  ;;  %v418_v24 = vpop.permute.xlu1 %417 }
  0x91   : > { %v510_v25 = vpop.permute.xlu1 %509  ;;  %v420_v26 = vpop.permute.xlu0 %419 }
  0x92   : > { %v425_v27 = vsel %vm423_vm8, %v420_v26, %v422_v23  ;;  %v424_v28 = vsel %vm423_vm8, %v418_v24, %v420_v26 }
  0x93   : > { %782 = vmatprep.subr.msk.mxu0 %vm241_vm3, %v425_v27 }
  0x94   : > { %783 = vmatpush1.msk.msra.mxu0 %vm241_vm3, %v424_v28 }
  0x95   : > { %784 = vmatmul.mubr.msk.f32.vlgmr.msra.gmra.mrb[0].mxu0 %vm237_vm6, %v781_v29  ;;  %v514_v30 = vpop.permute.xlu0 %513  ;;  %v512_v31 = vpop.permute.xlu1 %511 }
  0x96   : > { %v516_v32 = vsel %vm515_vm9, %v510_v25, %v512_v31  ;;  %v517_v33 = vsel %vm515_vm9, %v512_v31, %v514_v30  ;;  %589 = vmatprep.mubr.f32.mxu0 %v921_v1 }
  0x97   : > { %786 = vmatprep.subr.msk.mxu0 %vm241_vm3, %v517_v33 }
  0x98   : > { %787 = vmatpush1.msk.msra.mxu0 %vm241_vm3, %v516_v32 }
  0x99   : > { %v329_v34 = vpop.permute.xlu0 %328  ;;  %v331_v35 = vpop.permute.xlu1 %330 }
  0x9a   : > { %v334_v36 = vsel %vm332_vm10, %v329_v34, %v331_v35 }
  0x9b   : > { %778 = vmatprep.subr.msk.mxu1 %vm241_vm3, %v334_v36 }
  0x9d   : > { %v327_v38 = vpop.permute.xlu0 %326  ;;  %788 = vmatmul.mubr.msk.f32.vlgmr.msra.gmra.mrb[0].mxu0 %vm237_vm6, %v785_v37  ;;  %v603_v39 = vpop.permute.xlu1 %602 }
  0x9e   : > { %v333_v41 = vsel %vm332_vm10, %v327_v38, %v329_v34  ;;  %680 = vmatprep.mubr.f32.mxu0 %v921_v1 }
  0x9f   : > { %779 = vmatpush1.msk.msra.mxu1 %vm241_vm3, %v333_v41 }
  0xa0   : > { %780 = vmatmul.mubr.msk.f32.vlgmr.msra.gmra.mrb[0].mxu1 %vm237_vm6, %v777_v40 }
  0xa1   : > { %v605_v42 = vpop.permute.xlu0 %604  ;;  %v601_v43 = vpop.permute.xlu1 %600 }
  0xa2   : > { %v608_v44 = vsel %vm606_vm11, %v603_v39, %v605_v42  ;;  %v607_v45 = vsel %vm606_vm11, %v601_v43, %v603_v39 }
  0xa3   : > { %790 = vmatprep.subr.msk.mxu0 %vm241_vm3, %v608_v44 }
  0xa4   : > { %791 = vmatpush1.msk.msra.mxu0 %vm241_vm3, %v607_v45 }
  0xa5   : > { %792 = vmatmul.mubr.msk.f32.vlgmr.msra.gmra.mrb[0].mxu0 %vm237_vm6, %v789_v46 }
  0xb2   : > { %v234_v48 = vpop.permute.xlu0 %233 }
 0x173   : > { %v408_v47 = vpop.f32.mrb[0].mxu1 }
 0x174   : > { %v410_v49 = vpop.f32.mrb[1].mxu1  ;;  %v799_v50 = vadd.f32 %v408_v47, %v234_v48 }
 0x175   : > { %v801_v51 = vadd.f32 %v410_v49, %v234_v48 }
 0x178   : > { %v682_v52 = vpop.f32.mrb[0].mxu0 }
 0x179   : > { %v800_v53 = vadd.f32 %v799_v50, %v682_v52  ;;  %v684_v54 = vpop.f32.mrb[1].mxu0 }
 0x17a   : > { %v802_v55 = vadd.f32 %v801_v51, %v684_v54 }
 0x17c   : > { %v691_v56 = vcombine.low %v800_v53, %v802_v55 }
 0x17e   : > { %693 = vst [vmem:[%s163_s30] sm:$0xff] %v691_v56 }
 0x17f   : > { %870 = shalt.err (!%p867_p3)
}
 0x180   : > { %s871_s17 = scalar_lea.hbm %s1044_s7, 128  ;;  %s875_s24 = scalar_lea.hbm %s1089_s3, 256 }
 0x181   : > { %p872_p4 = scmp.ne.s32.totalorder %s1044_s7, %s871_s17  ;;  %p876_p9 = scmp.lt.u32.totalorder %s1044_s7, %s1089_s3 }
 0x182   : > { %p877_p10 = scmp.lt.u32.totalorder %s875_s24, %s871_s17  ;;  %p879_p12 = scmp.lt.u32.totalorder %s871_s17, %s1044_s7 }
 0x183   : > { %p873_p7 = pnand %p872_p4, %p986_p5 }
 0x184   : > { %p878_p11 = por %p877_p10, %p876_p9 }
 0x185   : > { %p874_p8 = pneg %p873_p7 }
 0x186   : > { %p880_p13 = por %p879_p12, %p878_p11 }
 0x188   : > { %p881_p0 = pnand %p880_p13, %p874_p8 }
 0x18a   : > { %884 = shalt.err (!%p881_p0)
}
 0x18b   : > { %810 = dma.vmem_to_hbm [thread:$0]  (%p986_p5), %s1046_s4, 128, %s1044_s7, %s695_s8  }
 0x18c PF: > { %p816_p1 = scmp.ge.s32.totalorder %s919_s15, 2  ;;  %s721_s27 = sand.u32 1, %s907_s12  }
 0x18d   : > { %s722_s28 = scalar_lea.sflag [#allocation3], %s721_s27 }
 0x18e   : > { %p813_p2 = pnand %p816_p1, %p990_p6 }
 0x190   : > { %902 = dma.done.wait (!%p813_p2), %s722_s28, 128  }
 0x191   : > { %904 = vsyncadd (!%p813_p2), %s722_s28, 4294967168  ;;  %p13_p3 = scmp.ge.s32.totalorder %s973_s18, 4   ;;  %s1092_s12 = smov %s911_s13 }
 0x192   : > { %s1093_s13 = smov %s915_s14  ;;  %s1094_s14 = smov %s984_s21 }
 0x193   : > { %s1095_s15 = smov %s973_s18  ;;  %15 = sbr.rel (!%p13_p3) target bundleno = 3 (0x3), region = 71 }
 0x19a   :  { %727 = vsyncpa [#allocation3], 1 }
 0x19b   :  { %729 = vsyncpa [#allocation3 + $0x1], 1 }

</bundles_post_ra>
